<compile_context>
chip_gen: v7x
topology: tpu7x:2x2x1
jax: 0.10.0
libtpu: 0.0.40
codegen_flags: <defaults>
</compile_context>

<pallas_src>
import functools

import jax
import jax.numpy as jnp
import numpy as np
from jax.experimental import pallas as pl
from jax.experimental.pallas import tpu as pltpu

_LANES = 128


def _dice_loss_kernel(pred_ref, true_ref, out_ref,
                      pt_acc, p_acc, t_acc, *, smooth, n_chunks):
    k = pl.program_id(0)

    @pl.when(k == 0)
    def _init():
        pt_acc[...] = jnp.zeros_like(pt_acc)
        p_acc[...] = jnp.zeros_like(p_acc)
        t_acc[...] = jnp.zeros_like(t_acc)

    x = pred_ref[...].astype(jnp.float32)          # (B, TN)
    t = true_ref[...].astype(jnp.float32)          # matches y_true.float()
    # sigmoid(x) = 0.5 * (tanh(x/2) + 1): single EUP transcendental / element.
    p = 0.5 * jnp.tanh(0.5 * x) + 0.5

    B = pt_acc.shape[0]
    pt_part = jnp.zeros((B, _LANES), jnp.float32)
    p_part = jnp.zeros((B, _LANES), jnp.float32)
    t_part = jnp.zeros((B, _LANES), jnp.float32)
    # Static, 128-lane-aligned column slices: pure VPU adds, no XLU per tile.
    for c in range(n_chunks):
        sl = slice(c * _LANES, (c + 1) * _LANES)
        pc = p[:, sl]
        tc = t[:, sl]
        pt_part = pt_part + pc * tc
        p_part = p_part + pc
        t_part = t_part + tc
    pt_acc[...] += pt_part
    p_acc[...] += p_part
    t_acc[...] += t_part

    @pl.when(k == pl.num_programs(0) - 1)
    def _finalize():
        inter = jnp.sum(pt_acc[...], axis=1, keepdims=True)         # (B, 1)
        union = (jnp.sum(p_acc[...], axis=1, keepdims=True)
                 + jnp.sum(t_acc[...], axis=1, keepdims=True))      # (B, 1)
        dice = (2.0 * inter + smooth) / (union + smooth)            # (B, 1)
        loss = 1.0 - jnp.sum(dice) / dice.shape[0]                  # scalar
        out_ref[...] = jnp.broadcast_to(loss, (1, 1)).astype(out_ref.dtype)


def _round_up(x, m):
    return (x + m - 1) // m * m


def dice_loss(y_pred, y_true, smooth=1e-6, tile_n=4096):
    """Pallas implementation of DiceLoss.forward (PyTorch semantics)."""
    assert y_pred.shape == y_true.shape
    B = y_pred.shape[0]
    N = int(np.prod(y_pred.shape[1:]))

    # Flatten to (B, N); keep native dtypes (bf16 preds / bool masks OK) so
    # the kernel streams the minimum number of HBM bytes.
    p2 = y_pred.reshape(B, N)
    t2 = y_true.reshape(B, N)

    # Lane-aligned reduction tile along N.
    n_lane = _round_up(N, _LANES)
    tn = min(_round_up(int(tile_n), _LANES), n_lane)
    n_pad = _round_up(N, tn)
    if n_pad != N:
        pad = n_pad - N
        # Padded preds -> sigmoid == 0 exactly; padded targets == 0.
        p2 = jnp.pad(p2, ((0, 0), (0, pad)), constant_values=-1e30)
        t2 = jnp.pad(t2, ((0, 0), (0, pad)), constant_values=0)

    num_tiles = n_pad // tn
    n_chunks = tn // _LANES

    out = pl.pallas_call(
        functools.partial(_dice_loss_kernel, smooth=float(smooth),
                          n_chunks=n_chunks),
        out_shape=jax.ShapeDtypeStruct((1, 1), jnp.float32),
        grid=(num_tiles,),
        in_specs=[
            pl.BlockSpec((B, tn), lambda k: (0, k)),
            pl.BlockSpec((B, tn), lambda k: (0, k)),
        ],
        out_specs=pl.BlockSpec((1, 1), lambda k: (0, 0)),
        scratch_shapes=[
            pltpu.VMEM((B, _LANES), jnp.float32),   # sum(p * t) partials
            pltpu.VMEM((B, _LANES), jnp.float32),   # sum(p) partials
            pltpu.VMEM((B, _LANES), jnp.float32),   # sum(t) partials
        ],
        compiler_params=pltpu.CompilerParams(
            dimension_semantics=("arbitrary",),     # reduction axis (carried acc)
        ),
    )(p2, t2)
    return out[0, 0]


def _reference_dice_loss(y_pred, y_true, smooth=1e-6):
    p = jax.nn.sigmoid(y_pred.astype(jnp.float32))
    t = y_true.astype(jnp.float32)
    inter = jnp.sum(p * t, axis=(1, 2, 3))
    union = jnp.sum(p, axis=(1, 2, 3)) + jnp.sum(t, axis=(1, 2, 3))
    dice = (2.0 * inter + smooth) / (union + smooth)
    return 1.0 - jnp.mean(dice)


if __name__ == "__main__":
    key = jax.random.PRNGKey(0)
    k1, k2 = jax.random.split(key)

    # Small shapes consistent with the module: (B, C, H, W) = (2, 4, 16, 16)
    y_pred = jax.random.normal(k1, (2, 4, 16, 16), dtype=jnp.float32)
    y_true = (jax.random.uniform(k2, (2, 4, 16, 16)) > 0.5).astype(jnp.float32)

    loss = dice_loss(y_pred, y_true)
    loss = jax.block_until_ready(loss)

    ref = jax.block_until_ready(_reference_dice_loss(y_pred, y_true))
    assert np.allclose(np.asarray(loss), np.asarray(ref),
                       rtol=1e-5, atol=1e-5), (loss, ref)

    print("KERNEL_OK")
</pallas_src>

<mosaic_0001>
module attributes {stable_mosaic.version = 11 : i64} {
  func.func @_dice_loss_kernel(%arg0: i32, %arg1: memref<2x1024xf32, #tpu.memory_space<vmem>>, %arg2: memref<2x1024xf32, #tpu.memory_space<vmem>>, %arg3: memref<1x1xf32, #tpu.memory_space<vmem>>, %arg4: memref<2x128xf32, #tpu.memory_space<vmem>>, %arg5: memref<2x128xf32, #tpu.memory_space<vmem>>, %arg6: memref<2x128xf32, #tpu.memory_space<vmem>>) attributes {dimension_semantics = [#tpu.dimension_semantics<arbitrary>], iteration_bounds = array<i64: 1>, scalar_prefetch = 0 : i64, scratch_operands = 3 : i64, tpu.core_type = #tpu.core_type<tc>, window_params = [{transform_indices = @transform_0, window_bounds = array<i64: 2, 1024>}, {transform_indices = @transform_1, window_bounds = array<i64: 2, 1024>}, {pipeline_mode = #tpu.pipeline_mode<synchronous>, transform_indices = @transform_2, window_bounds = array<i64: 1, 1>}]} {
    %c0_i32 = arith.constant 0 : i32
    %0 = arith.cmpi eq, %arg0, %c0_i32 : i32
    %1 = arith.extui %0 : i1 to i32
    %c0_i32_0 = arith.constant 0 : i32
    %2 = arith.cmpi ne, %1, %c0_i32_0 : i32
    scf.if %2 {
      %cst_23 = arith.constant 0.000000e+00 : f32
      %75 = vector.broadcast %cst_23 : f32 to vector<2x128xf32>
      %c0_24 = arith.constant 0 : index
      %c0_25 = arith.constant 0 : index
      %76 = vector.load %arg4[%c0_24, %c0_25] : memref<2x128xf32, #tpu.memory_space<vmem>>, vector<2x128xf32>
      tpu.vector_store %arg4[%c0_24, %c0_25], %75 {strides = array<i32>} : memref<2x128xf32, #tpu.memory_space<vmem>>, vector<2x128xf32>,
      %cst_26 = arith.constant 0.000000e+00 : f32
      %77 = vector.broadcast %cst_26 : f32 to vector<2x128xf32>
      %c0_27 = arith.constant 0 : index
      %c0_28 = arith.constant 0 : index
      %78 = vector.load %arg5[%c0_27, %c0_28] : memref<2x128xf32, #tpu.memory_space<vmem>>, vector<2x128xf32>
      tpu.vector_store %arg5[%c0_27, %c0_28], %77 {strides = array<i32>} : memref<2x128xf32, #tpu.memory_space<vmem>>, vector<2x128xf32>,
      %cst_29 = arith.constant 0.000000e+00 : f32
      %79 = vector.broadcast %cst_29 : f32 to vector<2x128xf32>
      %c0_30 = arith.constant 0 : index
      %c0_31 = arith.constant 0 : index
      %80 = vector.load %arg6[%c0_30, %c0_31] : memref<2x128xf32, #tpu.memory_space<vmem>>, vector<2x128xf32>
      tpu.vector_store %arg6[%c0_30, %c0_31], %79 {strides = array<i32>} : memref<2x128xf32, #tpu.memory_space<vmem>>, vector<2x128xf32>,
    } else {
    }
    %c0 = arith.constant 0 : index
    %c0_1 = arith.constant 0 : index
    %3 = vector.load %arg1[%c0, %c0_1] : memref<2x1024xf32, #tpu.memory_space<vmem>>, vector<2x1024xf32>
    %c0_2 = arith.constant 0 : index
    %c0_3 = arith.constant 0 : index
    %4 = vector.load %arg2[%c0_2, %c0_3] : memref<2x1024xf32, #tpu.memory_space<vmem>>, vector<2x1024xf32>
    %cst = arith.constant 5.000000e-01 : f32
    %5 = vector.broadcast %cst : f32 to vector<2x1024xf32>
    %6 = arith.mulf %5, %3 : vector<2x1024xf32>
    %7 = math.tanh %6 : vector<2x1024xf32>
    %cst_4 = arith.constant 5.000000e-01 : f32
    %8 = vector.broadcast %cst_4 : f32 to vector<2x1024xf32>
    %9 = arith.mulf %8, %7 : vector<2x1024xf32>
    %cst_5 = arith.constant 5.000000e-01 : f32
    %10 = vector.broadcast %cst_5 : f32 to vector<2x1024xf32>
    %11 = arith.addf %9, %10 : vector<2x1024xf32>
    %cst_6 = arith.constant 0.000000e+00 : f32
    %12 = vector.broadcast %cst_6 : f32 to vector<2x128xf32>
    %cst_7 = arith.constant 0.000000e+00 : f32
    %13 = vector.broadcast %cst_7 : f32 to vector<2x128xf32>
    %cst_8 = arith.constant 0.000000e+00 : f32
    %14 = vector.broadcast %cst_8 : f32 to vector<2x128xf32>
    %15 = vector.extract_strided_slice %11 {offsets = [0, 0], sizes = [2, 128], strides = [1, 1]} : vector<2x1024xf32> to vector<2x128xf32>
    %16 = vector.extract_strided_slice %4 {offsets = [0, 0], sizes = [2, 128], strides = [1, 1]} : vector<2x1024xf32> to vector<2x128xf32>
    %17 = arith.mulf %15, %16 : vector<2x128xf32>
    %18 = arith.addf %12, %17 : vector<2x128xf32>
    %19 = arith.addf %13, %15 : vector<2x128xf32>
    %20 = arith.addf %14, %16 : vector<2x128xf32>
    %21 = vector.extract_strided_slice %11 {offsets = [0, 128], sizes = [2, 128], strides = [1, 1]} : vector<2x1024xf32> to vector<2x128xf32>
    %22 = vector.extract_strided_slice %4 {offsets = [0, 128], sizes = [2, 128], strides = [1, 1]} : vector<2x1024xf32> to vector<2x128xf32>
    %23 = arith.mulf %21, %22 : vector<2x128xf32>
    %24 = arith.addf %18, %23 : vector<2x128xf32>
    %25 = arith.addf %19, %21 : vector<2x128xf32>
    %26 = arith.addf %20, %22 : vector<2x128xf32>
    %27 = vector.extract_strided_slice %11 {offsets = [0, 256], sizes = [2, 128], strides = [1, 1]} : vector<2x1024xf32> to vector<2x128xf32>
    %28 = vector.extract_strided_slice %4 {offsets = [0, 256], sizes = [2, 128], strides = [1, 1]} : vector<2x1024xf32> to vector<2x128xf32>
    %29 = arith.mulf %27, %28 : vector<2x128xf32>
    %30 = arith.addf %24, %29 : vector<2x128xf32>
    %31 = arith.addf %25, %27 : vector<2x128xf32>
    %32 = arith.addf %26, %28 : vector<2x128xf32>
    %33 = vector.extract_strided_slice %11 {offsets = [0, 384], sizes = [2, 128], strides = [1, 1]} : vector<2x1024xf32> to vector<2x128xf32>
    %34 = vector.extract_strided_slice %4 {offsets = [0, 384], sizes = [2, 128], strides = [1, 1]} : vector<2x1024xf32> to vector<2x128xf32>
    %35 = arith.mulf %33, %34 : vector<2x128xf32>
    %36 = arith.addf %30, %35 : vector<2x128xf32>
    %37 = arith.addf %31, %33 : vector<2x128xf32>
    %38 = arith.addf %32, %34 : vector<2x128xf32>
    %39 = vector.extract_strided_slice %11 {offsets = [0, 512], sizes = [2, 128], strides = [1, 1]} : vector<2x1024xf32> to vector<2x128xf32>
    %40 = vector.extract_strided_slice %4 {offsets = [0, 512], sizes = [2, 128], strides = [1, 1]} : vector<2x1024xf32> to vector<2x128xf32>
    %41 = arith.mulf %39, %40 : vector<2x128xf32>
    %42 = arith.addf %36, %41 : vector<2x128xf32>
    %43 = arith.addf %37, %39 : vector<2x128xf32>
    %44 = arith.addf %38, %40 : vector<2x128xf32>
    %45 = vector.extract_strided_slice %11 {offsets = [0, 640], sizes = [2, 128], strides = [1, 1]} : vector<2x1024xf32> to vector<2x128xf32>
    %46 = vector.extract_strided_slice %4 {offsets = [0, 640], sizes = [2, 128], strides = [1, 1]} : vector<2x1024xf32> to vector<2x128xf32>
    %47 = arith.mulf %45, %46 : vector<2x128xf32>
    %48 = arith.addf %42, %47 : vector<2x128xf32>
    %49 = arith.addf %43, %45 : vector<2x128xf32>
    %50 = arith.addf %44, %46 : vector<2x128xf32>
    %51 = vector.extract_strided_slice %11 {offsets = [0, 768], sizes = [2, 128], strides = [1, 1]} : vector<2x1024xf32> to vector<2x128xf32>
    %52 = vector.extract_strided_slice %4 {offsets = [0, 768], sizes = [2, 128], strides = [1, 1]} : vector<2x1024xf32> to vector<2x128xf32>
    %53 = arith.mulf %51, %52 : vector<2x128xf32>
    %54 = arith.addf %48, %53 : vector<2x128xf32>
    %55 = arith.addf %49, %51 : vector<2x128xf32>
    %56 = arith.addf %50, %52 : vector<2x128xf32>
    %57 = vector.extract_strided_slice %11 {offsets = [0, 896], sizes = [2, 128], strides = [1, 1]} : vector<2x1024xf32> to vector<2x128xf32>
    %58 = vector.extract_strided_slice %4 {offsets = [0, 896], sizes = [2, 128], strides = [1, 1]} : vector<2x1024xf32> to vector<2x128xf32>
    %59 = arith.mulf %57, %58 : vector<2x128xf32>
    %60 = arith.addf %54, %59 : vector<2x128xf32>
    %61 = arith.addf %55, %57 : vector<2x128xf32>
    %62 = arith.addf %56, %58 : vector<2x128xf32>
    %c0_9 = arith.constant 0 : index
    %c0_10 = arith.constant 0 : index
    %63 = vector.load %arg4[%c0_9, %c0_10] : memref<2x128xf32, #tpu.memory_space<vmem>>, vector<2x128xf32>
    %64 = arith.addf %63, %60 : vector<2x128xf32>
    %c0_11 = arith.constant 0 : index
    %c0_12 = arith.constant 0 : index
    %65 = vector.load %arg4[%c0_11, %c0_12] : memref<2x128xf32, #tpu.memory_space<vmem>>, vector<2x128xf32>
    tpu.vector_store %arg4[%c0_11, %c0_12], %64 {strides = array<i32>} : memref<2x128xf32, #tpu.memory_space<vmem>>, vector<2x128xf32>,
    %c0_13 = arith.constant 0 : index
    %c0_14 = arith.constant 0 : index
    %66 = vector.load %arg5[%c0_13, %c0_14] : memref<2x128xf32, #tpu.memory_space<vmem>>, vector<2x128xf32>
    %67 = arith.addf %66, %61 : vector<2x128xf32>
    %c0_15 = arith.constant 0 : index
    %c0_16 = arith.constant 0 : index
    %68 = vector.load %arg5[%c0_15, %c0_16] : memref<2x128xf32, #tpu.memory_space<vmem>>, vector<2x128xf32>
    tpu.vector_store %arg5[%c0_15, %c0_16], %67 {strides = array<i32>} : memref<2x128xf32, #tpu.memory_space<vmem>>, vector<2x128xf32>,
    %c0_17 = arith.constant 0 : index
    %c0_18 = arith.constant 0 : index
    %69 = vector.load %arg6[%c0_17, %c0_18] : memref<2x128xf32, #tpu.memory_space<vmem>>, vector<2x128xf32>
    %70 = arith.addf %69, %62 : vector<2x128xf32>
    %c0_19 = arith.constant 0 : index
    %c0_20 = arith.constant 0 : index
    %71 = vector.load %arg6[%c0_19, %c0_20] : memref<2x128xf32, #tpu.memory_space<vmem>>, vector<2x128xf32>
    tpu.vector_store %arg6[%c0_19, %c0_20], %70 {strides = array<i32>} : memref<2x128xf32, #tpu.memory_space<vmem>>, vector<2x128xf32>,
    %c0_i32_21 = arith.constant 0 : i32
    %72 = arith.cmpi eq, %arg0, %c0_i32_21 : i32
    %73 = arith.extui %72 : i1 to i32
    %c0_i32_22 = arith.constant 0 : i32
    %74 = arith.cmpi ne, %73, %c0_i32_22 : i32
    scf.if %74 {
      %c0_23 = arith.constant 0 : index
      %c0_24 = arith.constant 0 : index
      %75 = vector.load %arg4[%c0_23, %c0_24] : memref<2x128xf32, #tpu.memory_space<vmem>>, vector<2x128xf32>
      %cst_25 = arith.constant dense<0.000000e+00> : vector<2xf32>
      %76 = vector.multi_reduction <add>, %75, %cst_25 [1] : vector<2x128xf32> to vector<2xf32>
      %77 = vector.shape_cast %76 : vector<2xf32> to vector<2x1xf32>
      %c0_26 = arith.constant 0 : index
      %c0_27 = arith.constant 0 : index
      %78 = vector.load %arg5[%c0_26, %c0_27] : memref<2x128xf32, #tpu.memory_space<vmem>>, vector<2x128xf32>
      %cst_28 = arith.constant dense<0.000000e+00> : vector<2xf32>
      %79 = vector.multi_reduction <add>, %78, %cst_28 [1] : vector<2x128xf32> to vector<2xf32>
      %80 = vector.shape_cast %79 : vector<2xf32> to vector<2x1xf32>
      %c0_29 = arith.constant 0 : index
      %c0_30 = arith.constant 0 : index
      %81 = vector.load %arg6[%c0_29, %c0_30] : memref<2x128xf32, #tpu.memory_space<vmem>>, vector<2x128xf32>
      %cst_31 = arith.constant dense<0.000000e+00> : vector<2xf32>
      %82 = vector.multi_reduction <add>, %81, %cst_31 [1] : vector<2x128xf32> to vector<2xf32>
      %83 = vector.shape_cast %82 : vector<2xf32> to vector<2x1xf32>
      %84 = arith.addf %80, %83 : vector<2x1xf32>
      %cst_32 = arith.constant 2.000000e+00 : f32
      %85 = vector.broadcast %cst_32 : f32 to vector<2x1xf32>
      %86 = arith.mulf %85, %77 : vector<2x1xf32>
      %cst_33 = arith.constant 9.99999997E-7 : f32
      %87 = vector.broadcast %cst_33 : f32 to vector<2x1xf32>
      %88 = arith.addf %86, %87 : vector<2x1xf32>
      %cst_34 = arith.constant 9.99999997E-7 : f32
      %89 = vector.broadcast %cst_34 : f32 to vector<2x1xf32>
      %90 = arith.addf %84, %89 : vector<2x1xf32>
      %91 = arith.divf %88, %90 : vector<2x1xf32>
      %92 = vector.shape_cast %91 : vector<2x1xf32> to vector<1x2x1xf32>
      %cst_35 = arith.constant dense<0.000000e+00> : vector<1xf32>
      %93 = vector.multi_reduction <add>, %92, %cst_35 [1, 2] : vector<1x2x1xf32> to vector<1xf32>
      %94 = vector.shape_cast %93 : vector<1xf32> to vector<1x1x1xf32>
      %95 = vector.extract %94[0, 0, 0] : f32 from vector<1x1x1xf32>
      %cst_36 = arith.constant 2.000000e+00 : f32
      %96 = arith.divf %95, %cst_36 : f32
      %cst_37 = arith.constant 1.000000e+00 : f32
      %97 = arith.subf %cst_37, %96 : f32
      %98 = vector.broadcast %97 : f32 to vector<1x1xf32>
      %c0_38 = arith.constant 0 : index
      %c0_39 = arith.constant 0 : index
      %99 = vector.load %arg3[%c0_38, %c0_39] : memref<1x1xf32, #tpu.memory_space<vmem>>, vector<1x1xf32>
      tpu.vector_store %arg3[%c0_38, %c0_39], %98 {strides = array<i32>} : memref<1x1xf32, #tpu.memory_space<vmem>>, vector<1x1xf32>,
    } else {
    }
    return
  }
  func.func @transform_0(%arg0: i32) -> (i32, i32) {
    %c0_i32 = arith.constant 0 : i32
    %c0_i32_0 = arith.constant 0 : i32
    return %c0_i32, %arg0 : i32, i32
  }
  func.func @transform_1(%arg0: i32) -> (i32, i32) {
    %c0_i32 = arith.constant 0 : i32
    %c0_i32_0 = arith.constant 0 : i32
    return %c0_i32, %arg0 : i32, i32
  }
  func.func @transform_2(%arg0: i32) -> (i32, i32) {
    %c0_i32 = arith.constant 0 : i32
    %c0_i32_0 = arith.constant 0 : i32
    %c0_i32_1 = arith.constant 0 : i32
    return %c0_i32, %c0_i32_0 : i32, i32
  }
}

</mosaic_0001>

<bundles_post_ra>
// kernel: tpu_custom_call.1
= control target key start
LH: loop header
LB: loop body
LE: loop exit
PB: predicated region body
PF: predicated region fallthrough
CT: control target
= control target key end

     0   :  { %7 = vsyncpa [#allocation6], 0  ;;  %s319_s0 = inlined_call_operand.hbm [shape: f32[2,1024], index: 0, kind: input, shape index: {}]   ;;  %s320_s1 = inlined_call_operand.hbm [shape: f32[2,1024], index: 1, kind: input, shape index: {}]   ;;  %s321_s2 = inlined_call_operand.hbm [shape: f32[1,1], index: 2, kind: output, shape index: {}]  }
   0x1   :  { %8 = vsyncpa [#allocation9], 0 }
   0x2   :  { %9 = vsyncpa [#allocation7], 0  ;;  %s264_s9 = smov [#allocation5]   ;;  %s265_s11 = smov [#allocation8]  }
   0x3   :  { %s16_s10 = sshll.u32 %s264_s9, 4  ;;  %s26_s12 = sshll.u32 %s265_s11, 4  ;;  %s17_s10 = int_to_ptr.vmem [resolvable:$true] %s16_s10  ;;  %s27_s12 = int_to_ptr.vmem [resolvable:$true] %s26_s12 }
   0x4   :  { %s192_s15 = scalar_lea.hbm %s319_s0, 256 }
   0x5   :  { %p193_p0 = scmp.ne.s32.totalorder %s319_s0, %s192_s15  ;;  %p196_p1 = scmp.lt.u32.totalorder %s192_s15, %s319_s0 }
   0x7   :  { %p198_p2 = pnand %p196_p1, %p193_p0 }
   0x9   :  { %201 = shalt.err (!%p198_p2)
}
   0xa   :  { %s202_s20 = scalar_lea.vmem %s17_s10, 256  ;;  %p207_p4 = scmp.lt.s32.totalorder %s17_s10, %s17_s10 }
   0xb   :  { %p203_p3 = scmp.ne.s32.totalorder %s17_s10, %s202_s20  ;;  %p208_p5 = scmp.lt.s32.totalorder %s202_s20, %s202_s20 }
   0xd   :  { %p209_p6 = por %p208_p5, %p207_p4 }
   0xf   :  { %p210_p7 = pnand %p209_p6, %p203_p3 }
  0x11   :  { %213 = shalt.err (!%p210_p7)
}
  0x12   :  { %19 = dma.hbm_to_vmem [thread:$0]  %s319_s0, 256, %s17_s10, [#allocation6]  }
  0x13   :  { %s214_s25 = scalar_lea.hbm %s320_s1, 256 }
  0x14   :  { %p215_p8 = scmp.ne.s32.totalorder %s320_s1, %s214_s25  ;;  %p218_p9 = scmp.lt.u32.totalorder %s214_s25, %s320_s1 }
  0x16   :  { %p220_p10 = pnand %p218_p9, %p215_p8 }
  0x18   :  { %223 = shalt.err (!%p220_p10)
}
  0x19   :  { %s224_s30 = scalar_lea.vmem %s27_s12, 256  ;;  %p229_p12 = scmp.lt.s32.totalorder %s27_s12, %s27_s12 }
  0x1a   :  { %p225_p11 = scmp.ne.s32.totalorder %s27_s12, %s224_s30  ;;  %p230_p13 = scmp.lt.s32.totalorder %s224_s30, %s224_s30 }
  0x1c   :  { %p231_p0 = por %p230_p13, %p229_p12 }
  0x1e   :  { %p232_p1 = pnand %p231_p0, %p225_p11 }
  0x20   :  { %235 = shalt.err (!%p232_p1)
}
  0x21   :  { %29 = dma.hbm_to_vmem [thread:$0]  %s320_s1, 256, %s27_s12, [#allocation9]  }
  0x22   :  { %258 = dma.done.wait [#allocation6], 256  }
  0x23   :  { %259 = vsyncadd [#allocation6], 4294967040 }
  0x24   :  { %260 = dma.done.wait [#allocation9], 256  }
  0x25   :  { %261 = vsyncadd [#allocation9], 4294967040  ;;  %v266_v0 = vmov 0.0   ;;  %v43_v1 = vld [vmem:[#allocation5] sm:$0xff]  ;;  %v44_v2 = vld [vmem:[#allocation5 + $0x8] sm:$0xff]  ;;  %vm128_vm0 = vcmask 1041408  }
  0x26   :  { %41 = vst [vmem:[#allocation3] sm:$0x3] %v266_v0  ;;  %40 = vst [vmem:[#allocation2] sm:$0x3] %v266_v0  ;;  %v45_v3 = vld [vmem:[#allocation8] sm:$0xff]  ;;  %v47_v4 = vmul.f32 0.5, %v43_v1 }
  0x27   :  { %42 = vst [vmem:[#allocation4] sm:$0x3] %v266_v0  ;;  %v48_v5 = vmul.f32 0.5, %v44_v2  ;;  %v63_v6 = vrot.slane %v45_v3, 2  ;;  %v71_v7 = vrot.slane %v45_v3, 4  ;;  %v79_v9 = vrot.slane %v45_v3, 6 }
  0x28   :  { %186 = vtanh.f32 %v47_v4  ;;  %v46_v10 = vld [vmem:[#allocation8 + $0x8] sm:$0xff]  ;;  %vm146_vm1 = vcmask 1024   ;;  %s267_s5 = smov [#allocation10]   ;;  %vm162_vm2 = vcmask 0  }
  0x29   :  { %v68_v8 = vadd.f32 %v63_v6, %v45_v3  ;;  %188 = vtanh.f32 %v48_v5  ;;  %v93_v13 = vrot.slane %v46_v10, 2  ;;  %v101_v15 = vrot.slane %v46_v10, 4  ;;  %s170_s6 = sshll.u32 %s267_s5, 4  ;;  %s171_s6 = int_to_ptr.vmem [resolvable:$true] %s170_s6 }
  0x2a   :  { %v109_v17 = vrot.slane %v46_v10, 6  ;;  %s236_s8 = scalar_lea.vmem %s171_s6, 16  ;;  %s240_s9 = scalar_lea.vmem %s171_s6, 32 }
  0x2b   :  { %v76_v11 = vadd.f32 %v71_v7, %v68_v8  ;;  %p237_p2 = scmp.ne.s32.totalorder %s171_s6, %s236_s8  ;;  %p241_p3 = scmp.lt.s32.totalorder %s171_s6, %s171_s6 }
  0x2c   :  { %p242_p4 = scmp.lt.s32.totalorder %s240_s9, %s236_s8 }
  0x2d   :  { %v84_v12 = vadd.f32 %v79_v9, %v76_v11  ;;  %v118_v53 = vld [vmem:[#allocation3] sm:$0x3]  ;;  %v115_v56 = vld [vmem:[#allocation2] sm:$0x3] }
  0x2e   :  { %v121_v22 = vld [vmem:[#allocation4] sm:$0x3]  ;;  %p243_p5 = por %p242_p4, %p241_p3 }
  0x2f   :  { %v88_v14 = vadd.f32 %v84_v12, %v46_v10 }
  0x30   :  { %p244_p6 = pnand %p243_p5, %p237_p2 }
  0x31   :  { %v98_v16 = vadd.f32 %v93_v13, %v88_v14 }
  0x32   :  { %v187_v18 = vpop.eup %186 }
  0x33   :  { %v106_v19 = vadd.f32 %v101_v15, %v98_v16  ;;  %v189_v20 = vpop.eup %188  ;;  %v51_v21 = vmul.f32 0.5, %v187_v18 }
  0x34   :  { %v52_v23 = vmul.f32 0.5, %v189_v20 }
  0x35   :  { %v114_v24 = vadd.f32 %v109_v17, %v106_v19  ;;  %v53_v25 = vadd.f32 0.5, %v51_v21 }
  0x36   :  { %v54_v30 = vadd.f32 0.5, %v52_v23 }
  0x37   :  { %v122_v26 = vadd.f32 %v121_v22, %v114_v24  ;;  %v60_v27 = vrot.slane %v53_v25, 2  ;;  %v69_v28 = vrot.slane %v53_v25, 4  ;;  %v55_v29 = vmul.f32 %v53_v25, %v45_v3 }
  0x38   :  { %v77_v32 = vrot.slane %v53_v25, 6  ;;  %v90_v39 = vrot.slane %v54_v30, 2  ;;  %v85_v41 = vmul.f32 %v54_v30, %v46_v10  ;;  %v99_v43 = vrot.slane %v54_v30, 4 }
  0x39   :  { %123 = vst [vmem:[#allocation4] sm:$0x3] %v122_v26  ;;  %v67_v31 = vadd.f32 %v60_v27, %v53_v25  ;;  %v65_v33 = vmul.f32 %v63_v6, %v60_v27  ;;  %v73_v34 = vmul.f32 %v71_v7, %v69_v28  ;;  %v107_v47 = vrot.slane %v54_v30, 6 }
  0x3a   :  { %v81_v37 = vmul.f32 %v79_v9, %v77_v32  ;;  %v95_v45 = vmul.f32 %v93_v13, %v90_v39  ;;  %v103_v49 = vmul.f32 %v101_v15, %v99_v43 }
  0x3b   :  { %v75_v35 = vadd.f32 %v69_v28, %v67_v31  ;;  %v66_v36 = vadd.f32 %v65_v33, %v55_v29  ;;  %v111_v52 = vmul.f32 %v109_v17, %v107_v47 }
  0x3d   :  { %v83_v38 = vadd.f32 %v77_v32, %v75_v35  ;;  %v74_v40 = vadd.f32 %v73_v34, %v66_v36 }
  0x3f   :  { %v87_v42 = vadd.f32 %v83_v38, %v54_v30  ;;  %v82_v44 = vadd.f32 %v81_v37, %v74_v40 }
  0x40   :  { %v136_v61 = vld [vmem:[#allocation4] sm:$0x3] }
  0x41   :  { %v97_v46 = vadd.f32 %v90_v39, %v87_v42  ;;  %v86_v48 = vadd.f32 %v85_v41, %v82_v44  ;;  %v137_v0 = vsel %vm128_vm0, %v136_v61, 0.0 }
  0x43   :  { %v105_v50 = vadd.f32 %v99_v43, %v97_v46  ;;  %v96_v51 = vadd.f32 %v95_v45, %v86_v48 }
  0x45   :  { %v113_v54 = vadd.f32 %v107_v47, %v105_v50  ;;  %v104_v55 = vadd.f32 %v103_v49, %v96_v51 }
  0x47   :  { %v119_v57 = vadd.f32 %v118_v53, %v113_v54  ;;  %v112_v58 = vadd.f32 %v111_v52, %v104_v55 }
  0x49   :  { %120 = vst [vmem:[#allocation3] sm:$0x3] %v119_v57  ;;  %v116_v59 = vadd.f32 %v115_v56, %v112_v58 }
  0x4b   :  { %117 = vst [vmem:[#allocation2] sm:$0x3] %v116_v59 }
  0x50   :  { %v132_v60 = vld [vmem:[#allocation3] sm:$0x3] }
  0x51   :  { %v133_v62 = vsel %vm128_vm0, %v132_v60, 0.0 }
  0x52   :  { %134 = vadd.xlane.f32.xlu0 %v133_v62  ;;  %v127_v63 = vld [vmem:[#allocation2] sm:$0x3] }
  0x53   :  { %v129_v1 = vsel %vm128_vm0, %v127_v63, 0.0 }
  0x54   :  { %130 = vadd.xlane.f32.xlu1 %v129_v1 }
  0x56   :  { %138 = vadd.xlane.f32.xlu0 %v137_v0 }
  0xdf   :  { %v135_v2 = vpop.xlane.xlu0 %134 }
  0xe1   :  { %v131_v6 = vpop.xlane.xlu1 %130 }
  0xe2   :  { %v141_v7 = vmul.f32 2.0, %v131_v6 }
  0xe3   :  { %v139_v3 = vpop.xlane.xlu0 %138 }
  0xe4   :  { %v140_v4 = vadd.f32 %v139_v3, %v135_v2  ;;  %v142_v8 = vadd.f32 1e-06, %v141_v7 }
  0xe6   :  { %v143_v5 = vadd.f32 1e-06, %v140_v4 }
  0xe8   :  { %190 = vrcp.f32 %v143_v5 }
  0xf2   :  { %v191_v9 = vpop.eup %190 }
  0xf3   :  { %v145_v10 = vmul.f32 %v191_v9, %v142_v8 }
  0xf5   :  { %v147_v11 = vsel %vm146_vm1, %v145_v10, 0.0 }
  0xf6   :  { %148 = vadd.xlane.f32.xlu1 %v147_v11 }
 0x183   :  { %v149_v12 = vpop.xlane.xlu1 %148 }
 0x184   :  { %v150_v13 = vrot.slane %v149_v12, 4 }
 0x186   :  { %v151_v14 = vadd.f32 %v150_v13, %v149_v12 }
 0x188   :  { %v152_v15 = vrot.slane %v151_v14, 2 }
 0x18a   :  { %v153_v16 = vadd.f32 %v152_v15, %v151_v14 }
 0x18c   :  { %v154_v17 = vrot.slane %v153_v16, 1 }
 0x18e   :  { %v155_v18 = vadd.f32 %v154_v17, %v153_v16 }
 0x190   :  { %180 = vpush %v155_v18 }
 0x1c1   :  { %s181_s1 = spop %180 }
 0x1c2   :  { %s159_s4 = smul.f32 0.5, %s181_s1 }
 0x1c4   :  { %s160_s7 = ssub.f32 1.0, %s159_s4 }
 0x1c6   :  { %v161_v19 = vstv %s160_s7 }
 0x1c7   :  { %163 = vst.msk [vmem:[#allocation10] sm:$0x1] %vm162_vm2, %v161_v19 }
 0x1c8   :  { %247 = shalt.err (!%p244_p6)
}
 0x1c9   :  { %s248_s12 = scalar_lea.hbm %s321_s2, 16 }
 0x1ca   :  { %p249_p7 = scmp.ne.s32.totalorder %s321_s2, %s248_s12  ;;  %p252_p8 = scmp.lt.u32.totalorder %s248_s12, %s321_s2 }
 0x1cc   :  { %p254_p9 = pnand %p252_p8, %p249_p7 }
 0x1ce   :  { %257 = shalt.err (!%p254_p9)
}
 0x1cf   :  { %173 = dma.vmem_to_hbm [thread:$0]  %s171_s6, 16, %s321_s2, [#allocation7]  }
 0x1d0   :  { %262 = dma.done.wait [#allocation7], 16  }
 0x1d1   :  { %263 = vsyncadd [#allocation7], 4294967280 }
 0x1d2   :  { %177 = vsyncpa [#allocation6], 1 }
 0x1d3   :  { %178 = vsyncpa [#allocation9], 1 }
 0x1d4   :  { %179 = vsyncpa [#allocation7], 1 }

</bundles_post_ra>
